<compile_context>
chip_gen: v7x
topology: tpu7x:2x2x1
jax: 0.10.0
libtpu: 0.0.40
codegen_flags: <defaults>
</compile_context>

<pallas_src>
import functools

import jax
import jax.numpy as jnp
from jax import lax
from jax.experimental import pallas as pl
from jax.experimental.pallas import tpu as pltpu

# TODO(synk): `dummy.forward` only delegates to an arbitrary `net`; the inner
# net here (Conv2d(4,8,3,pad=1)+ReLU) is a deterministic synthetic choice.

KH = KW = 3  # kernel size of the inner Conv2d
PAD = 1


def _conv_relu_kernel(x_ref, w_ref, b_ref, o_ref, im2col_ref, *, H, W, C, OC):
    """One batch element per grid step; channels on sublanes, spatial on lanes.

    x_ref      : (1, C, H*W + 2*(W+1))  flattened input, zero-padded on lanes
    w_ref      : (OC, KH*KW*C)          im2col weight matrix (tap-major, c-minor)
    b_ref      : (OC, 1)                bias column (lane-broadcast)
    o_ref      : (1, OC, H*W)           lane-dense output
    im2col_ref : (KH*KW*C, H*W) f32     VMEM scratch for the im2col matrix
    """
    HW = H * W
    base = W + 1  # lane offset of pixel (0, 0) inside the extended flat axis

    # Column index of every flattened output position (hoisted out of the
    # tap loop). Avoid vector integer division: W is a power of two here.
    pos = lax.broadcasted_iota(jnp.int32, (C, HW), 1)
    if W & (W - 1) == 0:
        col = jnp.bitwise_and(pos, W - 1)
    else:  # generic fallback (untested path for non power-of-two widths)
        col = pos - (pos // W) * W

    # Build the (KH*KW*C, HW) im2col matrix: 9 static lane-offset window loads.
    for kh in range(KH):
        for kw in range(KW):
            dy, dx = kh - PAD, kw - PAD
            start = base + dy * W + dx                     # static, in [0, 2W+2]
            patch = x_ref[0, :, start:start + HW].astype(jnp.float32)  # (C, HW)
            # Rows that fall outside the image land in the zero padding of the
            # extended flat axis; only column wrap-around needs masking.
            if dx < 0:
                patch = jnp.where(col >= -dx, patch, 0.0)
            elif dx > 0:
                patch = jnp.where(col < W - dx, patch, 0.0)
            tap = kh * KW + kw
            im2col_ref[tap * C:(tap + 1) * C, :] = patch

    # Single MXU matmul: (OC, KH*KW*C) @ (KH*KW*C, HW) -> (OC, HW), lane-dense.
    acc = jnp.dot(w_ref[...].astype(jnp.float32), im2col_ref[...],
                  preferred_element_type=jnp.float32)
    acc = acc + b_ref[...].astype(jnp.float32)             # (OC, 1) lane-broadcast
    o_ref[0] = jnp.maximum(acc, 0.0).astype(o_ref.dtype)   # ReLU + unmasked store


def dummy_forward(x_nchw, w_oihw, bias):
    """Pallas equivalent of dummy(net)(x) with net = Conv2d(4,8,3,pad=1)+ReLU.

    x_nchw : (N, C, H, W) float32
    w_oihw : (OC, C, KH, KW) float32   (PyTorch Conv2d weight layout)
    bias   : (OC,) float32
    returns (N, OC, H, W) float32
    """
    N, C, H, W = x_nchw.shape
    OC = w_oihw.shape[0]
    HW = H * W
    EXT = HW + 2 * (W + 1)          # flattened spatial axis with zero skirt
    KC = KH * KW * C                # im2col contraction size

    # ---- glue: free reshape + tiny pad, NO transposes of the activations ----
    x_flat = x_nchw.reshape(N, C, HW)
    x_ext = jnp.pad(x_flat, ((0, 0), (0, 0), (W + 1, W + 1)))
    # (OC, C, KH, KW) -> (OC, KH, KW, C) -> (OC, KH*KW*C): tap-major, c-minor
    w_mat = jnp.transpose(w_oihw, (0, 2, 3, 1)).reshape(OC, KC)
    b_col = bias.reshape(OC, 1)

    kernel = functools.partial(_conv_relu_kernel, H=H, W=W, C=C, OC=OC)

    out_flat = pl.pallas_call(
        kernel,
        out_shape=jax.ShapeDtypeStruct((N, OC, HW), x_nchw.dtype),
        grid_spec=pltpu.PrefetchScalarGridSpec(
            num_scalar_prefetch=0,
            grid=(N,),
            in_specs=[
                pl.BlockSpec((1, C, EXT), lambda n: (n, 0, 0)),
                # weights / bias: grid-invariant index maps -> stay resident
                pl.BlockSpec((OC, KC), lambda n: (0, 0)),
                pl.BlockSpec((OC, 1), lambda n: (0, 0)),
            ],
            out_specs=pl.BlockSpec((1, OC, HW), lambda n: (n, 0, 0)),
            scratch_shapes=[pltpu.VMEM((KC, HW), jnp.float32)],
        ),
        compiler_params=pltpu.CompilerParams(
            dimension_semantics=("parallel",)),
    )(x_ext, w_mat, b_col)

    # back to PyTorch NCHW convention (free reshape, no data movement)
    return out_flat.reshape(N, OC, H, W)


def _reference(x_nchw, w_oihw, bias):
    """Pure-JAX reference (XLA conv) for correctness checking."""
    out = lax.conv_general_dilated(
        x_nchw, w_oihw,
        window_strides=(1, 1),
        padding=((PAD, PAD), (PAD, PAD)),
        dimension_numbers=("NCHW", "OIHW", "NCHW"),
    )
    out = out + bias.reshape(1, -1, 1, 1)
    return jnp.maximum(out, 0.0)


if __name__ == "__main__":
    key = jax.random.PRNGKey(0)
    kx, kwt, kb = jax.random.split(key, 3)

    N, C, H, W = 2, 4, 16, 16
    OC = 8

    x = jax.random.normal(kx, (N, C, H, W), dtype=jnp.float32)
    w = 0.1 * jax.random.normal(kwt, (OC, C, KH, KW), dtype=jnp.float32)
    b = 0.05 * jax.random.normal(kb, (OC,), dtype=jnp.float32)

    out = jax.block_until_ready(dummy_forward(x, w, b))
    ref = jax.block_until_ready(_reference(x, w, b))

    assert out.shape == (N, OC, H, W), out.shape
    assert jnp.allclose(out, ref, atol=1e-4, rtol=1e-4), "mismatch vs reference"

    print("KERNEL_OK")
</pallas_src>

<mosaic_0001>
module attributes {stable_mosaic.version = 11 : i64} {
  func.func @_conv_relu_kernel(%arg0: i32, %arg1: memref<1x4x290xf32, #tpu.memory_space<vmem>>, %arg2: memref<8x36xf32, #tpu.memory_space<vmem>>, %arg3: memref<8x1xf32, #tpu.memory_space<vmem>>, %arg4: memref<1x8x256xf32, #tpu.memory_space<vmem>>, %arg5: memref<36x256xf32, #tpu.memory_space<vmem>>) attributes {dimension_semantics = [#tpu.dimension_semantics<parallel>], iteration_bounds = array<i64: 2>, scalar_prefetch = 0 : i64, scratch_operands = 1 : i64, tpu.core_type = #tpu.core_type<tc>, window_params = [{transform_indices = @transform_0, window_bounds = array<i64: 1, 4, 290>}, {pipeline_mode = #tpu.pipeline_mode<synchronous>, transform_indices = @transform_1, window_bounds = array<i64: 8, 36>}, {pipeline_mode = #tpu.pipeline_mode<synchronous>, transform_indices = @transform_2, window_bounds = array<i64: 8, 1>}, {transform_indices = @transform_3, window_bounds = array<i64: 1, 8, 256>}]} {
    %0 = tpu.iota {dimensions = array<i32: 1>} : vector<4x256xi32>
    %c15_i32 = arith.constant 15 : i32
    %1 = vector.broadcast %c15_i32 : i32 to vector<4x256xi32>
    %2 = arith.andi %0, %1 : vector<4x256xi32>
    %c0 = arith.constant 0 : index
    %c0_0 = arith.constant 0 : index
    %c0_1 = arith.constant 0 : index
    %3 = vector.load %arg1[%c0, %c0_0, %c0_1] : memref<1x4x290xf32, #tpu.memory_space<vmem>>, vector<1x4x256xf32>
    %4 = vector.shape_cast %3 : vector<1x4x256xf32> to vector<4x256xf32>
    %c1_i32 = arith.constant 1 : i32
    %5 = vector.broadcast %c1_i32 : i32 to vector<4x256xi32>
    %6 = arith.cmpi sge, %2, %5 : vector<4x256xi32>
    %cst = arith.constant 0.000000e+00 : f32
    %7 = vector.broadcast %cst : f32 to vector<4x256xf32>
    %8 = arith.select %6, %4, %7 : vector<4x256xi1>, vector<4x256xf32>
    %c0_2 = arith.constant 0 : index
    %c0_3 = arith.constant 0 : index
    %9 = vector.load %arg5[%c0_2, %c0_3] : memref<36x256xf32, #tpu.memory_space<vmem>>, vector<4x256xf32>
    tpu.vector_store %arg5[%c0_2, %c0_3], %8 {strides = array<i32>} : memref<36x256xf32, #tpu.memory_space<vmem>>, vector<4x256xf32>,
    %c0_4 = arith.constant 0 : index
    %c0_5 = arith.constant 0 : index
    %c1 = arith.constant 1 : index
    %10 = vector.load %arg1[%c0_4, %c0_5, %c1] : memref<1x4x290xf32, #tpu.memory_space<vmem>>, vector<1x4x256xf32>
    %11 = vector.shape_cast %10 : vector<1x4x256xf32> to vector<4x256xf32>
    %c4 = arith.constant 4 : index
    %c0_6 = arith.constant 0 : index
    %12 = vector.load %arg5[%c4, %c0_6] : memref<36x256xf32, #tpu.memory_space<vmem>>, vector<4x256xf32>
    tpu.vector_store %arg5[%c4, %c0_6], %11 {strides = array<i32>} : memref<36x256xf32, #tpu.memory_space<vmem>>, vector<4x256xf32>,
    %c0_7 = arith.constant 0 : index
    %c0_8 = arith.constant 0 : index
    %c2 = arith.constant 2 : index
    %13 = vector.load %arg1[%c0_7, %c0_8, %c2] : memref<1x4x290xf32, #tpu.memory_space<vmem>>, vector<1x4x256xf32>
    %14 = vector.shape_cast %13 : vector<1x4x256xf32> to vector<4x256xf32>
    %c15_i32_9 = arith.constant 15 : i32
    %15 = vector.broadcast %c15_i32_9 : i32 to vector<4x256xi32>
    %16 = arith.cmpi slt, %2, %15 : vector<4x256xi32>
    %cst_10 = arith.constant 0.000000e+00 : f32
    %17 = vector.broadcast %cst_10 : f32 to vector<4x256xf32>
    %18 = arith.select %16, %14, %17 : vector<4x256xi1>, vector<4x256xf32>
    %c8 = arith.constant 8 : index
    %c0_11 = arith.constant 0 : index
    %19 = vector.load %arg5[%c8, %c0_11] : memref<36x256xf32, #tpu.memory_space<vmem>>, vector<4x256xf32>
    tpu.vector_store %arg5[%c8, %c0_11], %18 {strides = array<i32>} : memref<36x256xf32, #tpu.memory_space<vmem>>, vector<4x256xf32>,
    %c0_12 = arith.constant 0 : index
    %c0_13 = arith.constant 0 : index
    %c16 = arith.constant 16 : index
    %20 = vector.load %arg1[%c0_12, %c0_13, %c16] : memref<1x4x290xf32, #tpu.memory_space<vmem>>, vector<1x4x256xf32>
    %21 = vector.shape_cast %20 : vector<1x4x256xf32> to vector<4x256xf32>
    %c1_i32_14 = arith.constant 1 : i32
    %22 = vector.broadcast %c1_i32_14 : i32 to vector<4x256xi32>
    %23 = arith.cmpi sge, %2, %22 : vector<4x256xi32>
    %cst_15 = arith.constant 0.000000e+00 : f32
    %24 = vector.broadcast %cst_15 : f32 to vector<4x256xf32>
    %25 = arith.select %23, %21, %24 : vector<4x256xi1>, vector<4x256xf32>
    %c12 = arith.constant 12 : index
    %c0_16 = arith.constant 0 : index
    %26 = vector.load %arg5[%c12, %c0_16] : memref<36x256xf32, #tpu.memory_space<vmem>>, vector<4x256xf32>
    tpu.vector_store %arg5[%c12, %c0_16], %25 {strides = array<i32>} : memref<36x256xf32, #tpu.memory_space<vmem>>, vector<4x256xf32>,
    %c0_17 = arith.constant 0 : index
    %c0_18 = arith.constant 0 : index
    %c17 = arith.constant 17 : index
    %27 = vector.load %arg1[%c0_17, %c0_18, %c17] : memref<1x4x290xf32, #tpu.memory_space<vmem>>, vector<1x4x256xf32>
    %28 = vector.shape_cast %27 : vector<1x4x256xf32> to vector<4x256xf32>
    %c16_19 = arith.constant 16 : index
    %c0_20 = arith.constant 0 : index
    %29 = vector.load %arg5[%c16_19, %c0_20] : memref<36x256xf32, #tpu.memory_space<vmem>>, vector<4x256xf32>
    tpu.vector_store %arg5[%c16_19, %c0_20], %28 {strides = array<i32>} : memref<36x256xf32, #tpu.memory_space<vmem>>, vector<4x256xf32>,
    %c0_21 = arith.constant 0 : index
    %c0_22 = arith.constant 0 : index
    %c18 = arith.constant 18 : index
    %30 = vector.load %arg1[%c0_21, %c0_22, %c18] : memref<1x4x290xf32, #tpu.memory_space<vmem>>, vector<1x4x256xf32>
    %31 = vector.shape_cast %30 : vector<1x4x256xf32> to vector<4x256xf32>
    %c15_i32_23 = arith.constant 15 : i32
    %32 = vector.broadcast %c15_i32_23 : i32 to vector<4x256xi32>
    %33 = arith.cmpi slt, %2, %32 : vector<4x256xi32>
    %cst_24 = arith.constant 0.000000e+00 : f32
    %34 = vector.broadcast %cst_24 : f32 to vector<4x256xf32>
    %35 = arith.select %33, %31, %34 : vector<4x256xi1>, vector<4x256xf32>
    %c20 = arith.constant 20 : index
    %c0_25 = arith.constant 0 : index
    %36 = vector.load %arg5[%c20, %c0_25] : memref<36x256xf32, #tpu.memory_space<vmem>>, vector<4x256xf32>
    tpu.vector_store %arg5[%c20, %c0_25], %35 {strides = array<i32>} : memref<36x256xf32, #tpu.memory_space<vmem>>, vector<4x256xf32>,
    %c0_26 = arith.constant 0 : index
    %c0_27 = arith.constant 0 : index
    %c32 = arith.constant 32 : index
    %37 = vector.load %arg1[%c0_26, %c0_27, %c32] : memref<1x4x290xf32, #tpu.memory_space<vmem>>, vector<1x4x256xf32>
    %38 = vector.shape_cast %37 : vector<1x4x256xf32> to vector<4x256xf32>
    %c1_i32_28 = arith.constant 1 : i32
    %39 = vector.broadcast %c1_i32_28 : i32 to vector<4x256xi32>
    %40 = arith.cmpi sge, %2, %39 : vector<4x256xi32>
    %cst_29 = arith.constant 0.000000e+00 : f32
    %41 = vector.broadcast %cst_29 : f32 to vector<4x256xf32>
    %42 = arith.select %40, %38, %41 : vector<4x256xi1>, vector<4x256xf32>
    %c24 = arith.constant 24 : index
    %c0_30 = arith.constant 0 : index
    %43 = vector.load %arg5[%c24, %c0_30] : memref<36x256xf32, #tpu.memory_space<vmem>>, vector<4x256xf32>
    tpu.vector_store %arg5[%c24, %c0_30], %42 {strides = array<i32>} : memref<36x256xf32, #tpu.memory_space<vmem>>, vector<4x256xf32>,
    %c0_31 = arith.constant 0 : index
    %c0_32 = arith.constant 0 : index
    %c33 = arith.constant 33 : index
    %44 = vector.load %arg1[%c0_31, %c0_32, %c33] : memref<1x4x290xf32, #tpu.memory_space<vmem>>, vector<1x4x256xf32>
    %45 = vector.shape_cast %44 : vector<1x4x256xf32> to vector<4x256xf32>
    %c28 = arith.constant 28 : index
    %c0_33 = arith.constant 0 : index
    %46 = vector.load %arg5[%c28, %c0_33] : memref<36x256xf32, #tpu.memory_space<vmem>>, vector<4x256xf32>
    tpu.vector_store %arg5[%c28, %c0_33], %45 {strides = array<i32>} : memref<36x256xf32, #tpu.memory_space<vmem>>, vector<4x256xf32>,
    %c0_34 = arith.constant 0 : index
    %c0_35 = arith.constant 0 : index
    %c34 = arith.constant 34 : index
    %47 = vector.load %arg1[%c0_34, %c0_35, %c34] : memref<1x4x290xf32, #tpu.memory_space<vmem>>, vector<1x4x256xf32>
    %48 = vector.shape_cast %47 : vector<1x4x256xf32> to vector<4x256xf32>
    %c15_i32_36 = arith.constant 15 : i32
    %49 = vector.broadcast %c15_i32_36 : i32 to vector<4x256xi32>
    %50 = arith.cmpi slt, %2, %49 : vector<4x256xi32>
    %cst_37 = arith.constant 0.000000e+00 : f32
    %51 = vector.broadcast %cst_37 : f32 to vector<4x256xf32>
    %52 = arith.select %50, %48, %51 : vector<4x256xi1>, vector<4x256xf32>
    %c32_38 = arith.constant 32 : index
    %c0_39 = arith.constant 0 : index
    %53 = vector.load %arg5[%c32_38, %c0_39] : memref<36x256xf32, #tpu.memory_space<vmem>>, vector<4x256xf32>
    tpu.vector_store %arg5[%c32_38, %c0_39], %52 {strides = array<i32>} : memref<36x256xf32, #tpu.memory_space<vmem>>, vector<4x256xf32>,
    %c0_40 = arith.constant 0 : index
    %c0_41 = arith.constant 0 : index
    %54 = vector.load %arg2[%c0_40, %c0_41] : memref<8x36xf32, #tpu.memory_space<vmem>>, vector<8x36xf32>
    %c0_42 = arith.constant 0 : index
    %c0_43 = arith.constant 0 : index
    %55 = vector.load %arg5[%c0_42, %c0_43] : memref<36x256xf32, #tpu.memory_space<vmem>>, vector<36x256xf32>
    %cst_44 = arith.constant dense<0.000000e+00> : vector<8x256xf32>
    %56 = tpu.matmul %54, %55, %cst_44 {dimension_numbers = #tpu.dot_dimension_numbers<[1], [0], [0], [1], [0, 0, 1, 1], [], []>} : vector<8x36xf32>, vector<36x256xf32>, vector<8x256xf32> -> vector<8x256xf32>
    %c0_45 = arith.constant 0 : index
    %c0_46 = arith.constant 0 : index
    %57 = vector.load %arg3[%c0_45, %c0_46] : memref<8x1xf32, #tpu.memory_space<vmem>>, vector<8x1xf32>
    %58 = vector.broadcast %57 : vector<8x1xf32> to vector<8x256xf32>
    %59 = arith.addf %56, %58 : vector<8x256xf32>
    %cst_47 = arith.constant 0.000000e+00 : f32
    %60 = vector.broadcast %cst_47 : f32 to vector<8x256xf32>
    %61 = arith.maximumf %59, %60 : vector<8x256xf32>
    %c0_48 = arith.constant 0 : index
    %c0_49 = arith.constant 0 : index
    %c0_50 = arith.constant 0 : index
    %62 = vector.load %arg4[%c0_48, %c0_49, %c0_50] : memref<1x8x256xf32, #tpu.memory_space<vmem>>, vector<1x8x256xf32>
    %63 = vector.shape_cast %62 : vector<1x8x256xf32> to vector<8x256xf32>
    %64 = vector.shape_cast %61 : vector<8x256xf32> to vector<1x8x256xf32>
    tpu.vector_store %arg4[%c0_48, %c0_49, %c0_50], %64 {strides = array<i32>} : memref<1x8x256xf32, #tpu.memory_space<vmem>>, vector<1x8x256xf32>,
    return
  }
  func.func @transform_0(%arg0: i32) -> (i32, i32, i32) {
    %c0_i32 = arith.constant 0 : i32
    %c0_i32_0 = arith.constant 0 : i32
    %c0_i32_1 = arith.constant 0 : i32
    return %arg0, %c0_i32, %c0_i32_0 : i32, i32, i32
  }
  func.func @transform_1(%arg0: i32) -> (i32, i32) {
    %c0_i32 = arith.constant 0 : i32
    %c0_i32_0 = arith.constant 0 : i32
    %c0_i32_1 = arith.constant 0 : i32
    return %c0_i32, %c0_i32_0 : i32, i32
  }
  func.func @transform_2(%arg0: i32) -> (i32, i32) {
    %c0_i32 = arith.constant 0 : i32
    %c0_i32_0 = arith.constant 0 : i32
    %c0_i32_1 = arith.constant 0 : i32
    return %c0_i32, %c0_i32_0 : i32, i32
  }
  func.func @transform_3(%arg0: i32) -> (i32, i32, i32) {
    %c0_i32 = arith.constant 0 : i32
    %c0_i32_0 = arith.constant 0 : i32
    %c0_i32_1 = arith.constant 0 : i32
    return %arg0, %c0_i32, %c0_i32_0 : i32, i32, i32
  }
}

</mosaic_0001>

<bundles_post_ra>
// kernel: tpu_custom_call.1
= control target key start
LH: loop header
LB: loop body
LE: loop exit
PB: predicated region body
PF: predicated region fallthrough
CT: control target
= control target key end

     0   :  { %8 = vsyncpa [#allocation4], 0  ;;  %s1009_s0 = inlined_call_operand.hbm [shape: f32[2,4,290], index: 0, kind: input, shape index: {}]   ;;  %s1010_s1 = inlined_call_operand.vmem [shape: f32[8,36], index: 1, kind: input, shape index: {}]   ;;  %s1011_s2 = inlined_call_operand.vmem [shape: f32[8,1], index: 2, kind: input, shape index: {}]   ;;  %s1012_s3 = inlined_call_operand.hbm [shape: f32[2,8,256], index: 3, kind: output, shape index: {}]  }
   0x1   :  { %10 = vsyncpa [#allocation4 + $0x1], 0 }
   0x2   :  { %11 = vsyncpa [#allocation5], 0 }
   0x3   :  { %13 = vsyncpa [#allocation5 + $0x1], 0  ;;  %s777_s12 = smov 0   ;;  %s779_s13 = smov 0  }
   0x4   :  { %s781_s14 = smov 0   ;;  %s783_s15 = smov 0  }
   0x5 LB: > { %s798_s16 = sadd.s32 4294967295, %s743_s15   ;;  %s560_s17 = sadd.s32 4294967294, %s743_s15   ;;  %s743_s15 = sphi %s783_s15, %s1034_s15   ;;  %s739_s14 = sphi %s781_s14, %s1033_s14   ;;  %s735_s13 = sphi %s779_s13, %s1032_s13   ;;  %s731_s12 = sphi %s777_s12, %s1031_s12  }
   0x6   : > { %s802_s18 = sadd.s32 1, %s743_s15   ;;  %s26_s19 = sadd.s32 1, %s739_s14 }
   0x7   : > { %s23_s20 = ssub.s32 %s743_s15, %s802_s18  ;;  %p33_p0 = scmp.ne.s32.totalorder %s739_s14, %s735_s13 }
   0x8   : > { %p24_p1 = scmp.eq.s32.totalorder %s23_s20, 0  ;;  %p34_p2 = scmp.eq.s32.totalorder %s743_s15, 0 }
   0x9   : > { %p39_p3 = scmp.ne.s32.totalorder %s735_s13, %s731_s12  ;;  %p40_p4 = scmp.eq.s32.totalorder %s798_s16, 0 }
   0xa   : > { %s814_s21 = scalar_select %p24_p1, %s739_s14, %s26_s19  }
   0xb   : > { %p35_p5 = por %p34_p2, %p33_p0  ;;  %p816_p6 = por %p40_p4, %p39_p3 }
   0xc   : > { %p105_p7 = scmp.eq.s32.totalorder %s798_s16, 1  ;;  %p111_p8 = scmp.eq.s32.totalorder %s560_s17, 1 }
   0xd   : > { %p598_p10 = scmp.lt.s32.totalorder %s743_s15, 2  ;;  %s137_s25 = sand.u32 1, %s739_s14  }
   0xe   : > { %p823_p11 = por %p105_p7, %p33_p0  ;;  %p827_p12 = por %p111_p8, %p39_p3 }
   0xf   : > { %s584_s26 = smul.u32 192, %s743_s15  ;;  %p838_p13 = pnand %p598_p10, %p35_p5 }
  0x10   : > { %s1015_s23 = scalar_select %p823_p11, 1, 0 }
  0x11   : > { %s1016_s24 = scalar_select %p827_p12, 1, 0 }
  0x12   : > { %s583_s27 = smul.u32 12, %s137_s25  ;;  %s836_s30 = scalar_lea.hbm %s1009_s0, %s584_s26 }
  0x13   : > { %s138_s7 = scalar_lea.sflag [#allocation4], %s137_s25  ;;  %s647_s8 = scalar_lea.hbm %s836_s30, 192 }
  0x14   : > { %s141_s5 = scalar_lea.vmem [#allocation3], %s583_s27  ;;  %p648_p2 = scmp.ne.s32.totalorder %s836_s30, %s647_s8 }
  0x15   : > { %s149_s6 = sshll.u32 %s141_s5, 4  ;;  %p649_p3 = pneg %p838_p13  ;;  %s843_s6 = int_to_ptr.vmem [resolvable:$true] %s149_s6 }
  0x16   : > { %s652_s11 = scalar_lea.hbm %s1009_s0, 384  ;;  %p653_p7 = scmp.lt.u32.totalorder %s836_s30, %s1009_s0 }
  0x17   : > { %p650_p4 = pnand %p649_p3, %p648_p2  ;;  %p654_p8 = scmp.lt.u32.totalorder %s652_s11, %s647_s8 }
  0x18   : > { %p656_p9 = scmp.lt.u32.totalorder %s647_s8, %s836_s30 }
  0x19   : > { %p651_p5 = pneg %p650_p4  ;;  %p655_p10 = por %p654_p8, %p653_p7 }
  0x1b   : > { %p657_p0 = por %p656_p9, %p655_p10 }
  0x1d   : > { %p658_p1 = pnand %p657_p0, %p651_p5 }
  0x1f   : > { %661 = shalt.err (!%p658_p1)
}
  0x20   : > { %s662_s20 = scalar_lea.vmem %s843_s6, 192  ;;  %s745_s25 = smov [#allocation3]  }
  0x21   : > { %p663_p2 = scmp.ne.s32.totalorder %s843_s6, %s662_s20  ;;  %s667_s26 = sshll.u32 %s745_s25, 4  ;;  %s668_s26 = int_to_ptr.vmem [resolvable:$false] %s667_s26 }
  0x22   : > { %s669_s27 = scalar_lea.vmem %s668_s26, 384  ;;  %p670_p11 = scmp.lt.s32.totalorder %s843_s6, %s668_s26 }
  0x23   : > { %p665_p4 = pnand %p663_p2, %p649_p3  ;;  %p671_p7 = scmp.lt.s32.totalorder %s669_s27, %s662_s20 }
  0x25   : > { %p666_p12 = pneg %p665_p4  ;;  %p672_p8 = por %p671_p7, %p670_p11 }
  0x27   : > { %p673_p9 = pnand %p672_p8, %p666_p12 }
  0x29   : > { %676 = shalt.err (!%p673_p9)
}
  0x2a   : > { %593 = dma.hbm_to_vmem [thread:$0]  (!%p838_p13), %s836_s30, 192, %s843_s6, %s138_s7  }
  0x2b   : > { %p1018_p0 = scmp.lt.s32.totalorder %s743_s15, 3  ;;  %p1019_p1 = scmp.ge.s32.totalorder %s743_s15, 1 }
  0x2d   : > { %p155_p3 = pnand %p1019_p1, %p1018_p0 }
  0x2e   : > { %s876_s28 = sand.u32 (!%p155_p3), 1, %s735_s13  }
  0x2f   : > { %158 = sbr.rel (%p155_p3) target bundleno = 458 (0x1ca), region = 32  ;;  %s161_s5 = scalar_lea.sflag (!%p155_p3), [#allocation4], %s876_s28 }
  0x30   : > { %s585_s29 = smul.u32 (!%p155_p3), 12, %s876_s28 }
  0x32   : > { %s880_s8 = scalar_lea.vmem (!%p155_p3), [#allocation3], %s585_s29 }
  0x36   : > { %722 = dma.done.wait (%p816_p6), %s161_s5, 192  }
  0x37   : > { %724 = vsyncadd (%p816_p6), %s161_s5, 4294967104  ;;  %v187_v0 = vlaneseq  ;;  %v244_v5 = vld [vmem:[%s880_s8 + $0x8] sm:$0xf]  ;;  %v243_v6 = vld [vmem:[%s880_s8] sm:$0xff]  ;;  %s746_s22 = smov 112   ;;  %s747_s30 = smov 126  }
  0x38   : > { %252 = vrot.lane.b32.xlu0 %v244_v5, %s746_s22  ;;  %248 = vrot.lane.b32.xlu1 %v243_v6, %s746_s22  ;;  %v247_v9 = vcombine.high %v243_v6, %v243_v6  ;;  %v222_v10 = vld [vmem:[%s880_s8 + $0x8] sm:$0xf]  ;;  %s748_s4 = smov 127   ;;  %v206_v14 = vcombine.low %v243_v6, %v243_v6  ;;  %s749_s6 = smov 110   ;;  %v754_v20 = vmov 0.0   ;;  %v755_v21 = vmov 0  }
  0x39   : > { %v886_v1 = vand.u32 127, %v187_v0  ;;  %v645_v13 = vld [vmem:[%s880_s8 + $0x8] ss:$0 sps:$4 sm:$0xff]   ;;  %s750_s7 = smov 96   ;;  %s751_s9 = smov 111   ;;  %464 = vmatprep.mubr.f32.mxu0 %v754_v20  ;;  %642 = vset.pattern.permute.xlu0 %v755_v21  ;;  %vm254_vm2 = vcmask 916480  }
  0x3a   : > { %v288_v15 = vld [vmem:[%s880_s8 + $0x8] sm:$0xf]  ;;  %s752_s10 = smov 95   ;;  %s753_s11 = smov 94   ;;  %vm234_vm3 = vcmask 1031168   ;;  %vm214_vm5 = vcmask 1039360  }
  0x3b   : > { %v889_v2 = vadd.s32 128, %v886_v1  ;;  %v190_v3 = vand.u32 15, %v886_v1  ;;  %v314_v16 = vld [vmem:[%s880_s8 + $0x8] sm:$0xf]  ;;  %vm298_vm7 = vcmask 900096   ;;  %vm324_vm8 = vcmask 785408  }
  0x3c   : > { %232 = vrot.lane.b32.xlu0 %v222_v10, %s747_s30  ;;  %210 = vrot.lane.b32.xlu1 %v243_v6, %s748_s4  ;;  %v270_v17 = vld [vmem:[%s880_s8 + $0x8] sm:$0xf]  ;;  %vm280_vm9 = vcmask 908288   ;;  %vm345_vm10 = vcmask 777216   ;;  %vm363_vm11 = vcmask 769024   ;;  %vm393_vm12 = vcmask 1043456  }
  0x3d   : > { %v191_v4 = vand.u32 15, %v889_v2  ;;  %vm897_vm0 = vcmp.ge.s32.totalorder %v190_v3, 1  ;;  %v646_v18 = vld [vmem:[%s880_s8 + $0x8] ss:$0 sps:$4 sm:$0xff]   ;;  %vm932_vm6 = vcmp.lt.s32.totalorder %v190_v3, 15  ;;  %vm389_vm13 = vcmask 293888  }
  0x3e   : > { %v198_v8 = vsel %vm897_vm0, %v243_v6, 0.0  ;;  %v353_v19 = vld [vmem:[%s880_s8 + $0x8] sm:$0xf]  ;;  %s565_s26 = sshll.u32 %s876_s28, 4  ;;  %s574_s27 = sshll.u32 %s798_s16, 8 }
  0x3f   : > { %200 = vst [vmem:[#allocation2] sm:$0xf] %v198_v8  ;;  %vm904_vm1 = vcmp.ge.s32.totalorder %v191_v4, 1  ;;  %v383_v22 = vld [vmem:[%s1011_s2] sm:$0xff]  ;;  %vm919_vm4 = vcmp.lt.s32.totalorder %v191_v4, 15  ;;  %s186_s29 = scalar_lea.vmem [#allocation6], %s565_s26 }
  0x40   : > { %v199_v12 = vsel %vm904_vm1, %v247_v9, 0.0  ;;  %250 = vrot.lane.b32.xlu0 %v247_v9, %s746_s22  ;;  %230 = vrot.lane.b32.xlu1 %v247_v9, %s747_s30  ;;  %s490_s5 = sshll.u32 %s186_s29, 4  ;;  %p1028_p11 = scmp.ne.s32.totalorder %s1015_s23, 0  ;;  %s967_s5 = int_to_ptr.vmem [resolvable:$true] %s490_s5 }
  0x41   : > { %201 = vst [vmem:[#allocation2 + $0x8] sm:$0xf] %v199_v12  ;;  %s756_s16 = smov [#allocation6]  }
  0x44   : > { %212 = vrot.lane.b32.xlu0 %v645_v13, %s748_s4  ;;  %228 = vrot.lane.b32.xlu1 %v243_v6, %s747_s30  ;;  %s965_s30 = scalar_lea.hbm %s1012_s3, %s574_s27 }
  0x48   : > { %294 = vrot.lane.b32.xlu1 %v247_v9, %s749_s6  ;;  %208 = vrot.lane.b32.xlu0 %v206_v14, %s748_s4  ;;  %s476_s4 = scalar_lea.sflag [#allocation5], %s876_s28 }
  0x4c   : > { %292 = vrot.lane.b32.xlu1 %v243_v6, %s749_s6  ;;  %296 = vrot.lane.b32.xlu0 %v288_v15, %s749_s6  ;;  %s677_s6 = scalar_lea.vmem %s967_s5, 256 }
  0x4d   : > { %p678_p6 = scmp.ne.s32.totalorder %s967_s5, %s677_s6 }
  0x4f   : > { %p679_p12 = pnand %p678_p6, %p1028_p11 }
  0x50   : > { %322 = vrot.lane.b32.xlu1 %v314_v16, %s750_s7  ;;  %320 = vrot.lane.b32.xlu0 %v247_v9, %s750_s7 }
  0x51   : > { %p680_p13 = pneg %p679_p12 }
  0x54   : > { %278 = vrot.lane.b32.xlu1 %v270_v17, %s751_s9  ;;  %276 = vrot.lane.b32.xlu0 %v247_v9, %s751_s9 }
  0x58   : > { %341 = vrot.lane.b32.xlu1 %v243_v6, %s752_s10  ;;  %318 = vrot.lane.b32.xlu0 %v243_v6, %s750_s7  ;;  %s681_s7 = sshll.u32 %s756_s16, 4  ;;  %s682_s7 = int_to_ptr.vmem [resolvable:$false] %s681_s7 }
  0x59   : > { %p684_p5 = scmp.lt.s32.totalorder %s967_s5, %s682_s7 }
  0x5c   : > { %274 = vrot.lane.b32.xlu1 %v243_v6, %s751_s9  ;;  %343 = vrot.lane.b32.xlu0 %v646_v18, %s752_s10  ;;  %s683_s9 = scalar_lea.vmem %s682_s7, 512 }
  0x5d   : > { %p685_p10 = scmp.lt.s32.totalorder %s683_s9, %s677_s6 }
  0x5f   : > { %p686_p2 = por %p685_p10, %p684_p5 }
  0x60   : > { %359 = vrot.lane.b32.xlu1 %v247_v9, %s753_s11  ;;  %339 = vrot.lane.b32.xlu0 %v206_v14, %s752_s10 }
  0x61   : > { %p687_p4 = pnand %p686_p2, %p680_p13 }
  0x64   : > { %357 = vrot.lane.b32.xlu1 %v243_v6, %s753_s11  ;;  %361 = vrot.lane.b32.xlu0 %v353_v19, %s753_s11 }
  0x68   : > { %386 = vperm.xlu0 %642, %v383_v22  }
  0xaa   : > { %v253_v23 = vpop.permute.xlu0 %252  ;;  %v249_v24 = vpop.permute.xlu1 %248 }
  0xae   : > { %v233_v25 = vpop.permute.xlu0 %232  ;;  %v211_v26 = vpop.permute.xlu1 %210 }
  0xb2   : > { %v251_v28 = vpop.permute.xlu0 %250  ;;  %v231_v29 = vpop.permute.xlu1 %230 }
  0xb3   : > { %v255_v30 = vsel %vm254_vm2, %v249_v24, %v251_v28  ;;  %v256_v31 = vsel %vm254_vm2, %v251_v28, %v253_v23  ;;  %v236_v32 = vsel %vm234_vm3, %v231_v29, %v233_v25 }
  0xb4   : > { %v259_v33 = vsel %vm897_vm0, %v255_v30, 0.0  ;;  %v260_v34 = vsel %vm904_vm1, %v256_v31, 0.0  ;;  %v240_v35 = vsel %vm919_vm4, %v236_v32, 0.0  ;;  %v372_v30 = vld [vmem:[%s1010_s1] sm:$0xff] }
  0xb5   : > { %v263_v36 = vrot.slane %v259_v33, 4  ;;  %v264_v37 = vrot.slane %v260_v34, 4  ;;  %242 = vst [vmem:[#allocation2 + $0x18] sm:$0xf] %v240_v35 }
  0xb6   : > { %v213_v39 = vpop.permute.xlu0 %212  ;;  %v229_v40 = vpop.permute.xlu1 %228 }
  0xb7   : > { %267 = vst [vmem:[#allocation2 + $0x10] sm:$0xf0] %v263_v36  ;;  %268 = vst [vmem:[#allocation2 + $0x18] sm:$0xf0] %v264_v37  ;;  %v216_v41 = vsel %vm214_vm5, %v211_v26, %v213_v39  ;;  %v235_v42 = vsel %vm234_vm3, %v229_v40, %v231_v29 }
  0xb8   : > { %220 = vst [vmem:[#allocation2 + $0x8] sm:$0xf0] %v216_v41  ;;  %v239_v43 = vsel %vm932_vm6, %v235_v42, 0.0 }
  0xb9   : > { %241 = vst [vmem:[#allocation2 + $0x10] sm:$0xf] %v239_v43 }
  0xba   : > { %v295_v44 = vpop.permute.xlu1 %294  ;;  %v209_v45 = vpop.permute.xlu0 %208 }
  0xbb   : > { %v215_v46 = vsel %vm214_vm5, %v209_v45, %v211_v26 }
  0xbc   : > { %219 = vst [vmem:[#allocation2] sm:$0xf0] %v215_v46 }
  0xbe   : > { %v293_v47 = vpop.permute.xlu1 %292  ;;  %v297_v48 = vpop.permute.xlu0 %296  ;;  %v376_v49 = vld [vmem:[#allocation2 + $0x18] sm:$0xff] }
  0xbf   : > { %v299_v50 = vsel %vm298_vm7, %v293_v47, %v295_v44  ;;  %v300_v51 = vsel %vm298_vm7, %v295_v44, %v297_v48  ;;  %v374_v52 = vld [vmem:[#allocation2 + $0x8] sm:$0xff] }
  0xc0   : > { %v303_v53 = vsel %vm932_vm6, %v299_v50, 0.0  ;;  %v304_v54 = vsel %vm919_vm4, %v300_v51, 0.0  ;;  %v575_v55 = vpack.c.bf16 %v376_v49, %v374_v52  ;;  %v375_v62 = vld [vmem:[#allocation2 + $0x10] sm:$0xff] }
  0xc1   : > { %v307_v56 = vrot.slane %v303_v53, 4  ;;  %v308_v57 = vrot.slane %v304_v54, 4 }
  0xc2   : > { %v323_v58 = vpop.permute.xlu1 %322  ;;  %v321_v59 = vpop.permute.xlu0 %320  ;;  %576 = vmatprep.subr.bf16.mxu0 %v575_v55 }
  0xc3   : > { %311 = vst [vmem:[#allocation2 + $0x20] sm:$0xf0] %v307_v56  ;;  %312 = vst [vmem:[#allocation2 + $0x28] sm:$0xf0] %v308_v57  ;;  %v326_v60 = vsel %vm324_vm8, %v321_v59, %v323_v58  ;;  %v373_v61 = vld [vmem:[#allocation2] sm:$0xff] }
  0xc4   : > { %v330_v63 = vsel %vm904_vm1, %v326_v60, 0.0  ;;  %v577_v0 = vpack.c.bf16 %v375_v62, %v373_v61 }
  0xc5   : > { %332 = vst [vmem:[#allocation2 + $0x38] sm:$0xf] %v330_v63 }
  0xc6   : > { %v279_v1 = vpop.permute.xlu1 %278  ;;  %v277_v2 = vpop.permute.xlu0 %276  ;;  %578 = vmatpush1.bf16.msra.mxu0 %v577_v0 }
  0xc7   : > { %v282_v3 = vsel %vm280_vm9, %v277_v2, %v279_v1 }
  0xc8   : > { %286 = vst [vmem:[#allocation2 + $0x28] sm:$0xf] %v282_v3 }
  0xca   : > { %v342_v4 = vpop.permute.xlu1 %341  ;;  %v319_v5 = vpop.permute.xlu0 %318 }
  0xcb   : > { %v325_v6 = vsel %vm324_vm8, %v319_v5, %v321_v59 }
  0xcc   : > { %v329_v8 = vsel %vm897_vm0, %v325_v6, 0.0 }
  0xcd   : > { %331 = vst [vmem:[#allocation2 + $0x30] sm:$0xf] %v329_v8 }
  0xce   : > { %v275_v9 = vpop.permute.xlu1 %274  ;;  %v344_v10 = vpop.permute.xlu0 %343 }
  0xcf   : > { %v281_v11 = vsel %vm280_vm9, %v275_v9, %v277_v2  ;;  %v347_v12 = vsel %vm345_vm10, %v342_v4, %v344_v10  ;;  %v378_v7 = vld [vmem:[#allocation2 + $0x28] sm:$0xff] }
  0xd0   : > { %285 = vst [vmem:[#allocation2 + $0x20] sm:$0xf] %v281_v11  ;;  %351 = vst [vmem:[#allocation2 + $0x38] sm:$0xf0] %v347_v12 }
  0xd2   : > { %v360_v13 = vpop.permute.xlu1 %359  ;;  %v340_v14 = vpop.permute.xlu0 %339 }
  0xd3   : > { %v346_v15 = vsel %vm345_vm10, %v340_v14, %v342_v4 }
  0xd4   : > { %350 = vst [vmem:[#allocation2 + $0x30] sm:$0xf0] %v346_v15 }
  0xd6   : > { %v358_v16 = vpop.permute.xlu1 %357  ;;  %v362_v17 = vpop.permute.xlu0 %361 }
  0xd7   : > { %v364_v18 = vsel %vm363_vm11, %v358_v16, %v360_v13  ;;  %v365_v19 = vsel %vm363_vm11, %v360_v13, %v362_v17  ;;  %v380_v20 = vld [vmem:[#allocation2 + $0x38] sm:$0xff]  ;;  %v377_v24 = vld [vmem:[#allocation2 + $0x20] sm:$0xff] }
  0xd8   : > { %v368_v21 = vsel %vm932_vm6, %v364_v18, 0.0  ;;  %v369_v22 = vsel %vm919_vm4, %v365_v19, 0.0  ;;  %v579_v23 = vpack.c.bf16 %v380_v20, %v378_v7 }
  0xd9   : > { %370 = vst [vmem:[#allocation2 + $0x40] sm:$0xf] %v368_v21  ;;  %371 = vst [vmem:[#allocation2 + $0x48] sm:$0xf] %v369_v22 }
  0xda   : > { %580 = vmatprep.subr.bf16.mxu0 %v579_v23 }
  0xdb   : > { %v379_v25 = vld [vmem:[#allocation2 + $0x30] sm:$0xff] }
  0xdc   : > { %v581_v26 = vpack.c.bf16 %v379_v25, %v377_v24 }
  0xde   : > { %582 = vmatpush1.bf16.msra.mxu0 %v581_v26 }
  0xe0   : > { %v382_v28 = vld [vmem:[#allocation2 + $0x48] sm:$0xf]  ;;  %v381_v29 = vld [vmem:[#allocation2 + $0x40] sm:$0xf] }
  0xe1   : > { %566 = vmatprep.subr.msk.mxu0 %vm393_vm12, %v382_v28 }
  0xe2   : > { %567 = vmatpush1.msk.msra.mxu0 %vm393_vm12, %v381_v29 }
  0xe3   : > { %568 = vmatmul.mubr.msk.f32.vlgmr.msra.gmra.mrb[0].mxu0 %vm389_vm13, %v372_v30 }
  0xe7   : > { %v387_v27 = vpop.permute.xlu0 %386 }
 0x1b6   : > { %v466_v31 = vpop.f32.mrb[0].mxu0 }
 0x1b7   : > { %v467_v32 = vadd.f32 %v466_v31, %v387_v27  ;;  %v468_v33 = vpop.f32.mrb[1].mxu0 }
 0x1b8   : > { %v469_v34 = vadd.f32 %v468_v33, %v387_v27 }
 0x1b9   : > { %v471_v35 = vmax.f32 %v467_v32, 0.0 }
 0x1ba   : > { %v472_v36 = vmax.f32 %v469_v34, 0.0 }
 0x1bb   : > { %473 = vst [vmem:[%s186_s29] sm:$0xff] %v471_v35 }
 0x1bc   : > { %474 = vst [vmem:[%s186_s29 + $0x8] sm:$0xff] %v472_v36 }
 0x1bd   : > { %690 = shalt.err (!%p687_p4)
}
 0x1be   : > { %s691_s28 = scalar_lea.hbm %s965_s30, 256  ;;  %s695_s17 = scalar_lea.hbm %s1012_s3, 512 }
 0x1bf   : > { %p692_p7 = scmp.ne.s32.totalorder %s965_s30, %s691_s28  ;;  %p696_p0 = scmp.lt.u32.totalorder %s965_s30, %s1012_s3 }
 0x1c0   : > { %p697_p1 = scmp.lt.u32.totalorder %s695_s17, %s691_s28  ;;  %p699_p6 = scmp.lt.u32.totalorder %s691_s28, %s965_s30 }
 0x1c1   : > { %p693_p8 = pnand %p692_p7, %p1028_p11 }
 0x1c2   : > { %p698_p3 = por %p697_p1, %p696_p0 }
 0x1c3   : > { %p694_p9 = pneg %p693_p8 }
 0x1c4   : > { %p700_p12 = por %p699_p6, %p698_p3 }
 0x1c6   : > { %p701_p13 = pnand %p700_p12, %p694_p9 }
 0x1c8   : > { %704 = shalt.err (!%p701_p13)
}
 0x1c9   : > { %588 = dma.vmem_to_hbm [thread:$0]  (%p1028_p11), %s967_s5, 256, %s965_s30, %s476_s4  }
 0x1ca PF: > { %s502_s25 = sand.u32 1, %s731_s12   ;;  %p1029_p5 = scmp.ne.s32.totalorder %s1016_s24, 0 }
 0x1cb   : > { %p1030_p10 = scmp.ge.s32.totalorder %s743_s15, 2  ;;  %s503_s26 = scalar_lea.sflag [#allocation5], %s502_s25 }
 0x1cd   : > { %p595_p2 = pnand %p1030_p10, %p1029_p5 }
 0x1cf   : > { %726 = dma.done.wait (!%p595_p2), %s503_s26, 256  }
 0x1d0   : > { %728 = vsyncadd (!%p595_p2), %s503_s26, 4294967040  ;;  %p16_p4 = scmp.ge.s32.totalorder %s802_s18, 4   ;;  %s1031_s12 = smov %s735_s13 }
 0x1d1   : > { %s1032_s13 = smov %s739_s14  ;;  %s1033_s14 = smov %s814_s21 }
 0x1d2   : > { %s1034_s15 = smov %s802_s18  ;;  %18 = sbr.rel (!%p16_p4) target bundleno = 5 (0x5), region = 77 }
 0x1d9   :  { %508 = vsyncpa [#allocation4], 1 }
 0x1da   :  { %510 = vsyncpa [#allocation4 + $0x1], 1 }
 0x1db   :  { %511 = vsyncpa [#allocation5], 1 }
 0x1dc   :  { %513 = vsyncpa [#allocation5 + $0x1], 1 }

</bundles_post_ra>
